<compile_context>
chip_gen: v5e
topology: v5e:2x2
jax: 0.10.0
libtpu: 0.0.40
codegen_flags: <defaults>
</compile_context>

<pallas_src>
import jax
import jax.numpy as jnp
from jax.experimental import pallas as pl
from jax.experimental.pallas import tpu as pltpu

IN_FEATURES = 10
OUT_FEATURES = 10
LANES = 128            # lane-padded RHS width for the MXU (weight only)
MAX_TILE_B = 8192      # rows per grid step (~16 MiB double-buffered working set)
MIN_SPLIT_ROWS = 2048  # below 2*this, a single grid step beats splitting


def _round_up(n, m):
    return ((n + m - 1) // m) * m


def linear_kernel(x_ref, w_ref, b_ref, o_ref):
    # x_ref: (tb, IN)  w_ref: (IN, LANES)  b_ref: (1, OUT)  o_ref: (tb, OUT)
    y = jnp.dot(x_ref[...], w_ref[...], preferred_element_type=jnp.float32)
    o_ref[...] = (y[:, :OUT_FEATURES] + b_ref[...]).astype(o_ref.dtype)


def prepare_params(weight, bias):
    """One-time prep: PyTorch (OUT, IN) weight -> pre-transposed, lane-padded RHS."""
    w_t = weight.T.astype(jnp.float32)                      # (IN, OUT)
    w_pad = jnp.zeros((IN_FEATURES, LANES), jnp.float32).at[:, :OUT_FEATURES].set(w_t)
    b2d = bias.astype(jnp.float32).reshape(1, OUT_FEATURES)  # unpadded bias
    return w_pad, b2d


def _pick_tile(padded_batch):
    if padded_batch <= MAX_TILE_B:
        if padded_batch >= 2 * MIN_SPLIT_ROWS:
            # >=2 grid steps so v7x's second TensorCore gets work.
            return _round_up(pl.cdiv(padded_batch, 2), 8)
        return padded_batch
    return MAX_TILE_B


def simple_model_forward(x, w_pad, b2d):
    """y = x @ weight.T + bias  (PyTorch nn.Linear semantics), via Pallas."""
    batch = x.shape[0]
    if batch == 0:
        return jnp.zeros((0, OUT_FEATURES), x.dtype)

    padded_batch = _round_up(batch, 8)
    if padded_batch != batch:
        x = jnp.pad(x, ((0, padded_batch - batch), (0, 0)))

    tb = _pick_tile(padded_batch)
    grid = (pl.cdiv(padded_batch, tb),)   # ragged last block is clipped by Pallas

    cost = pl.CostEstimate(
        flops=2 * padded_batch * IN_FEATURES * OUT_FEATURES,
        transcendentals=0,
        bytes_accessed=4 * (padded_batch * IN_FEATURES           # x
                            + IN_FEATURES * LANES                # W (padded, resident)
                            + OUT_FEATURES                       # b
                            + padded_batch * OUT_FEATURES),      # out (unpadded)
    )

    out = pl.pallas_call(
        linear_kernel,
        out_shape=jax.ShapeDtypeStruct((padded_batch, OUT_FEATURES), jnp.float32),
        grid=grid,
        in_specs=[
            pl.BlockSpec((tb, IN_FEATURES), lambda i: (i, 0)),        # x tile
            pl.BlockSpec((IN_FEATURES, LANES), lambda i: (0, 0)),     # W resident
            pl.BlockSpec((1, OUT_FEATURES), lambda i: (0, 0)),        # b resident
        ],
        out_specs=pl.BlockSpec((tb, OUT_FEATURES), lambda i: (i, 0)),
        compiler_params=pltpu.CompilerParams(
            dimension_semantics=("parallel",),
            vmem_limit_bytes=32 << 20),
        cost_estimate=cost,
    )(x, w_pad, b2d)

    return out[:batch]


if __name__ == "__main__":
    key = jax.random.PRNGKey(0)
    kx, kw, kb = jax.random.split(key, 3)

    batch = 8
    x = jax.random.normal(kx, (batch, IN_FEATURES), dtype=jnp.float32)

    # Deterministic parameter init (mimics nn.Linear's uniform(-1/sqrt(in), 1/sqrt(in)))
    bound = 1.0 / (IN_FEATURES ** 0.5)
    weight = jax.random.uniform(
        kw, (OUT_FEATURES, IN_FEATURES), dtype=jnp.float32, minval=-bound, maxval=bound
    )
    bias = jax.random.uniform(
        kb, (OUT_FEATURES,), dtype=jnp.float32, minval=-bound, maxval=bound
    )

    # One-time parameter prep (hoisted out of the steady-state call path).
    w_pad, b2d = prepare_params(weight, bias)

    out = simple_model_forward(x, w_pad, b2d)
    out = jax.block_until_ready(out)

    # Cross-check against plain JAX reference (nn.Linear semantics).
    ref = x @ weight.T + bias
    assert out.shape == (batch, OUT_FEATURES)
    assert jnp.allclose(out, ref, atol=1e-5, rtol=1e-5)

    print("KERNEL_OK")
</pallas_src>

<mosaic_0001>
module attributes {stable_mosaic.version = 11 : i64} {
  func.func @linear_kernel(%arg0: i32, %arg1: memref<8x10xf32, #tpu.memory_space<vmem>>, %arg2: memref<10x128xf32, #tpu.memory_space<vmem>>, %arg3: memref<1x10xf32, #tpu.memory_space<vmem>>, %arg4: memref<8x10xf32, #tpu.memory_space<vmem>>) attributes {dimension_semantics = [#tpu.dimension_semantics<parallel>], iteration_bounds = array<i64: 1>, scalar_prefetch = 0 : i64, scratch_operands = 0 : i64, tpu.core_type = #tpu.core_type<tc>, window_params = [{transform_indices = @transform_0, window_bounds = array<i64: 8, 10>}, {pipeline_mode = #tpu.pipeline_mode<synchronous>, transform_indices = @transform_1, window_bounds = array<i64: 10, 128>}, {pipeline_mode = #tpu.pipeline_mode<synchronous>, transform_indices = @transform_2, window_bounds = array<i64: 1, 10>}, {transform_indices = @transform_3, window_bounds = array<i64: 8, 10>}]} {
    %c0 = arith.constant 0 : index
    %c0_0 = arith.constant 0 : index
    %0 = vector.load %arg1[%c0, %c0_0] : memref<8x10xf32, #tpu.memory_space<vmem>>, vector<8x10xf32>
    %c0_1 = arith.constant 0 : index
    %c0_2 = arith.constant 0 : index
    %1 = vector.load %arg2[%c0_1, %c0_2] : memref<10x128xf32, #tpu.memory_space<vmem>>, vector<10x128xf32>
    %cst = arith.constant dense<0.000000e+00> : vector<8x128xf32>
    %2 = tpu.matmul %0, %1, %cst {dimension_numbers = #tpu.dot_dimension_numbers<[1], [0], [0], [1], [0, 0, 1, 1], [], []>} : vector<8x10xf32>, vector<10x128xf32>, vector<8x128xf32> -> vector<8x128xf32>
    %3 = vector.extract_strided_slice %2 {offsets = [0, 0], sizes = [8, 10], strides = [1, 1]} : vector<8x128xf32> to vector<8x10xf32>
    %c0_3 = arith.constant 0 : index
    %c0_4 = arith.constant 0 : index
    %4 = vector.load %arg3[%c0_3, %c0_4] : memref<1x10xf32, #tpu.memory_space<vmem>>, vector<1x10xf32>
    %5 = vector.broadcast %4 : vector<1x10xf32> to vector<8x10xf32>
    %6 = arith.addf %3, %5 : vector<8x10xf32>
    %c0_5 = arith.constant 0 : index
    %c0_6 = arith.constant 0 : index
    %7 = vector.load %arg4[%c0_5, %c0_6] : memref<8x10xf32, #tpu.memory_space<vmem>>, vector<8x10xf32>
    tpu.vector_store %arg4[%c0_5, %c0_6], %6 {strides = array<i32>} : memref<8x10xf32, #tpu.memory_space<vmem>>, vector<8x10xf32>,
    return
  }
  func.func @transform_0(%arg0: i32) -> (i32, i32) {
    %c0_i32 = arith.constant 0 : i32
    %c0_i32_0 = arith.constant 0 : i32
    return %arg0, %c0_i32 : i32, i32
  }
  func.func @transform_1(%arg0: i32) -> (i32, i32) {
    %c0_i32 = arith.constant 0 : i32
    %c0_i32_0 = arith.constant 0 : i32
    %c0_i32_1 = arith.constant 0 : i32
    return %c0_i32, %c0_i32_0 : i32, i32
  }
  func.func @transform_2(%arg0: i32) -> (i32, i32) {
    %c0_i32 = arith.constant 0 : i32
    %c0_i32_0 = arith.constant 0 : i32
    %c0_i32_1 = arith.constant 0 : i32
    return %c0_i32, %c0_i32_0 : i32, i32
  }
  func.func @transform_3(%arg0: i32) -> (i32, i32) {
    %c0_i32 = arith.constant 0 : i32
    %c0_i32_0 = arith.constant 0 : i32
    return %arg0, %c0_i32 : i32, i32
  }
}

</mosaic_0001>

<bundles_post_ra>
// kernel: tpu_custom_call.1
= control target key start
LH: loop header
LB: loop body
LE: loop exit
PB: predicated region body
PF: predicated region fallthrough
CT: control target
= control target key end

     0   :  { %8 = vsyncpa [#allocation3], 0  ;;  %s223_s0 = inlined_call_operand.hbm [shape: f32[8,10], index: 0, kind: input, shape index: {}]   ;;  %s224_s1 = inlined_call_operand.hbm [shape: f32[10,128], index: 1, kind: input, shape index: {}]   ;;  %s225_s2 = inlined_call_operand.vmem [shape: f32[1,10], index: 2, kind: input, shape index: {}]   ;;  %s226_s3 = inlined_call_operand.hbm [shape: f32[8,10], index: 3, kind: output, shape index: {}]  }
   0x1   :  { %9 = vsyncpa [#allocation6], 0 }
   0x2   :  { %10 = vsyncpa [#allocation4], 0  ;;  %s16_s14 = sshll.u32 %s223_s0, 4  ;;  %s186_s15 = smov [#allocation2]   ;;  %s17_s14 = int_to_ptr.hbm [resolvable:$true] %s16_s14 }
   0x3   :  { %s18_s16 = sshll.u32 %s186_s15, 4  ;;  %s26_s19 = sshll.u32 %s224_s1, 4  ;;  %s19_s16 = int_to_ptr.vmem [resolvable:$true] %s18_s16  ;;  %s27_s19 = int_to_ptr.hbm [resolvable:$true] %s26_s19 }
   0x4   :  { %21 = dma.hbm_to_vmem [thread:$0]  %s17_s14, 128, %s19_s16, [#allocation3]  }
   0x5   :  { %s187_s20 = smov [#allocation5]   ;;  %s188_s22 = smov 128  }
   0x6   :  { %s28_s21 = sshll.u32 %s187_s20, 4  ;;  %s189_s23 = smov 8   ;;  %s29_s21 = int_to_ptr.vmem [resolvable:$true] %s28_s21 }
   0x7   :  { %34 = dma.hbm_to_vmem [thread:$0]  %s27_s19, 256, %s29_s21, [#allocation6], %s188_s22, %s188_s22, %s189_s23  }
   0x8   :  { %180 = dma.done.wait [#allocation3], 128  }
   0x9   :  { %181 = vsyncadd [#allocation3], 4294967168 }
   0xa   :  { %182 = dma.done.wait [#allocation6], 256  }
   0xb   :  { %183 = vsyncadd [#allocation6], 4294967040  ;;  %vm52_vm0 = vcmask 1041408   ;;  %v47_v0 = vld [vmem:[#allocation5 + $0x8] sm:$0x3]  ;;  %v46_v1 = vld [vmem:[#allocation5] sm:$0xff] }
   0xc   :  { %100 = vmatpush.msk.msra.mxu0 %vm52_vm0, %v47_v0  ;;  %v45_v2 = vld [vmem:[#allocation2] sm:$0xff]  ;;  %vm48_vm1 = vcmask 80896   ;;  %s190_s24 = smov [#allocation7]   ;;  %s89_s28 = sshll.u32 %s226_s3, 4  ;;  %s90_s28 = int_to_ptr.hbm [resolvable:$true] %s89_s28 }
   0xd   :  { %v107_v3 = vld [vmem:[%s225_s2] ss:$0 sm:$0xff]  ;;  %s87_s25 = sshll.u32 %s190_s24, 4  ;;  %s88_s25 = int_to_ptr.vmem [resolvable:$true] %s87_s25 }
   0xe   :  { %71 = vmatpush.msra.mxu0 %v46_v1 }
   0xf   :  { %101 = vmatmul.msk.f32.vlgmr.msra.gmra.mxu0 %vm48_vm1, %v45_v2 }
  0x8c   :  { %v73_v4 = vpop.f32.mrf.mxu0 }
  0x8d   :  { %v80_v5 = vadd.f32 %v107_v3, %v73_v4 }
  0x8f   :  { %81 = vst.msk [vmem:[#allocation7] sm:$0xff] %vm48_vm1, %v80_v5 }
  0x90   :  { %92 = dma.vmem_to_hbm [thread:$0]  %s88_s25, 128, %s90_s28, [#allocation4]  }
  0x91   :  { %184 = dma.done.wait [#allocation4], 128  }
  0x92   :  { %185 = vsyncadd [#allocation4], 4294967168 }
  0x93   :  { %97 = vsyncpa [#allocation3], 1 }
  0x94   :  { %98 = vsyncpa [#allocation6], 1 }
  0x95   :  { %99 = vsyncpa [#allocation4], 1 }

</bundles_post_ra>
